<compile_context>
chip_gen: v7x
topology: tpu7x:2x2x1
jax: 0.10.0
libtpu: 0.0.40
codegen_flags: <defaults>
</compile_context>

<pallas_src>
import functools

import jax
import jax.numpy as jnp
from jax import lax
from jax.experimental import pallas as pl
from jax.experimental.pallas import tpu as pltpu


# ----------------------------------------------------------------------------
# Pass 1: conv (KH block-Toeplitz matmuls) + bias + LeakyReLU + BN partials
# ----------------------------------------------------------------------------
def conv_lrelu_stats_kernel(x_ref, w_ref, b_ref, y_ref, s_ref, *,
                            kh_size, dilation, h_out, negative_slope):
    """One grid step = `nb` whole images (full padded height).

    x_ref: (nb, H_pad, W_pad*Cin)   bf16  zero-padded input rows
    w_ref: (KH, W_pad*Cin, LN)      bf16  block-Toeplitz conv weights
    b_ref: (1, LN)                  f32   conv bias tiled over W_out lanes
    y_ref: (nb*H_out, LN)           bf16  pre-BN activations (lane-dense slab)
    s_ref: (1, 2, LN)               f32   per-step [sum, sum-of-squares]
    """
    m, ln = y_ref.shape
    k = x_ref.shape[-1]

    # f32 accumulator initialized with the conv bias (hoisted broadcast).
    acc = jnp.broadcast_to(b_ref[...], (m, ln))
    for kh in range(kh_size):
        r0 = kh * dilation
        # Rows r0 .. r0+H_out of every image in the block, folded into M.
        lhs = x_ref[:, r0:r0 + h_out, :].reshape(m, k)
        acc = acc + jnp.dot(lhs, w_ref[kh],
                            preferred_element_type=jnp.float32)

    # LeakyReLU in f32 (v5e VPU has no bf16 path).
    act = jnp.where(acc >= 0, acc, negative_slope * acc)

    # Single lane-dense (LN % 128 == 0) store of the activation slab.
    y_ref[...] = act.astype(y_ref.dtype)

    # Fused per-step BN partials (single sweep, f32 before the bf16 cast above).
    s_ref[0] = jnp.concatenate(
        [jnp.sum(act, axis=0, keepdims=True),
         jnp.sum(act * act, axis=0, keepdims=True)], axis=0)


# ----------------------------------------------------------------------------
# Block-size picker: fold images into the M axis, keep >= 2 grid steps
# ----------------------------------------------------------------------------
def _pick_images_per_step(n, h_out, per_image_block_bytes, *,
                          target_rows=512, budget_bytes=12 * 1024 * 1024):
    valid = []
    for nb in range(1, n + 1):
        if n % nb:
            continue
        if (nb * h_out) % 8 and nb != n:      # M block must be 8-row tileable
            continue
        if nb * per_image_block_bytes > budget_bytes and nb != 1:
            continue
        valid.append(nb)
    if not valid:
        valid = [n]
    # prefer >= 2 grid steps (v7x has 2 TCs) and M close to the target rows
    cands = [nb for nb in valid if n // nb >= 2] or valid
    under = [nb for nb in cands if nb * h_out <= target_rows] or [min(cands)]
    return max(under)


# ----------------------------------------------------------------------------
# Wrapper: NCHW in / NCHW out, matching PyTorch Conv2DLeakyReLUBN.forward
# ----------------------------------------------------------------------------
def conv2d_leakyrelu_bn(x_nchw, weight_oihw, bias, gamma, beta, *,
                        padding, dilation, negative_slope, eps=1e-5):
    n, cin, h, w = x_nchw.shape
    cout, cin_w, kh_size, kw_size = weight_oihw.shape
    assert cin == cin_w
    h_out = h + 2 * padding - dilation * (kh_size - 1)
    w_out = w + 2 * padding - dilation * (kw_size - 1)
    h_pad = h + 2 * padding
    w_pad = w + 2 * padding
    wc_in = w_pad * cin
    ln = w_out * cout
    ln_pad = ((ln + 127) // 128) * 128        # lane-dense (unmasked vst) width

    # ---- glue: layout + zero padding (no halo duplication / gather) --------
    x_nhwc = jnp.transpose(x_nchw, (0, 2, 3, 1)).astype(jnp.float32)
    x_p = jnp.pad(x_nhwc,
                  ((0, 0), (padding, padding), (padding, padding), (0, 0)))
    x_flat = x_p.reshape(n, h_pad, wc_in).astype(jnp.bfloat16)

    # Block-Toeplitz conv weights (one-time layout transform):
    #   wmat[kh, (wo + kw*dil)*Cin + ci, wo*Cout + co] = W[co, ci, kh, kw]
    w_t = jnp.transpose(weight_oihw, (2, 3, 1, 0)).astype(jnp.float32)
    eye = jnp.eye(w_out, dtype=jnp.float32)
    wmats = []
    for kh in range(kh_size):
        m_kh = jnp.zeros((wc_in, ln), jnp.float32)
        for kw in range(kw_size):
            blockdiag = jnp.kron(eye, w_t[kh, kw])      # (W_out*Cin, W_out*Cout)
            top = kw * dilation * cin
            m_kh = m_kh + jnp.pad(
                blockdiag, ((top, wc_in - w_out * cin - top), (0, 0)))
        wmats.append(m_kh)
    wmat = jnp.stack(wmats)                              # (KH, wc_in, ln)
    wmat = jnp.pad(wmat, ((0, 0), (0, 0), (0, ln_pad - ln))).astype(jnp.bfloat16)
    b_lane = jnp.pad(jnp.tile(bias.astype(jnp.float32), w_out),
                     (0, ln_pad - ln)).reshape(1, ln_pad)

    # ---- tiling: fold nb images into M per grid step -------------------------
    per_image_block_bytes = 4 * (h_pad * wc_in + h_out * ln_pad)  # bf16, 2x buf
    nb = _pick_images_per_step(n, h_out, per_image_block_bytes)
    grid_steps = n // nb
    # NOTE: if a single image exceeded the VMEM budget (very large H), an
    # overlapping-row-tile path (manual DMA with halo) would be needed here.

    cparams = pltpu.CompilerParams(
        dimension_semantics=("parallel",),
        vmem_limit_bytes=48 * 1024 * 1024)   # <= v7x 64 MiB VMEM, fine elsewhere

    flops = 2 * n * kh_size * h_out * wc_in * ln_pad
    bytes_accessed = (2 * (x_flat.size + wmat.size + n * h_out * ln_pad)
                      + 4 * (grid_steps * 2 * ln_pad + ln_pad))

    kern = functools.partial(
        conv_lrelu_stats_kernel, kh_size=kh_size, dilation=dilation,
        h_out=h_out, negative_slope=negative_slope)

    y_slab, partials = pl.pallas_call(
        kern,
        out_shape=(jax.ShapeDtypeStruct((n * h_out, ln_pad), jnp.bfloat16),
                   jax.ShapeDtypeStruct((grid_steps, 2, ln_pad), jnp.float32)),
        grid=(grid_steps,),
        in_specs=[
            pl.BlockSpec((nb, h_pad, wc_in), lambda i: (i, 0, 0)),
            pl.BlockSpec((kh_size, wc_in, ln_pad), lambda i: (0, 0, 0)),
            pl.BlockSpec((1, ln_pad), lambda i: (0, 0)),
        ],
        out_specs=(
            pl.BlockSpec((nb * h_out, ln_pad), lambda i: (i, 0)),
            pl.BlockSpec((1, 2, ln_pad), lambda i: (i, 0, 0)),
        ),
        compiler_params=cparams,
        cost_estimate=pl.CostEstimate(flops=flops, transcendentals=0,
                                      bytes_accessed=bytes_accessed),
    )(x_flat, wmat, b_lane)

    # ---- tiny cross-step combine + BN finalize (two-pass scheme) -----------
    cnt = n * h_out * w_out
    sum_c = jnp.sum(partials[:, 0, :ln], axis=0).reshape(w_out, cout).sum(0)
    sq_c = jnp.sum(partials[:, 1, :ln], axis=0).reshape(w_out, cout).sum(0)
    mean = sum_c / cnt
    var = jnp.maximum(sq_c / cnt - mean * mean, 0.0)   # biased var, clamp >= 0
    inv = lax.rsqrt(var + eps)
    scale = gamma.astype(jnp.float32) * inv
    shift = beta.astype(jnp.float32) - mean * scale
    # TODO(synk): emit BatchNorm2d running_mean/running_var updates (momentum,
    # unbiased var) as additional outputs for full training-buffer parity.

    # ---- BN apply fused by XLA with the slab -> NCHW layout transform -------
    y = y_slab[:, :ln].astype(jnp.float32).reshape(n, h_out, w_out, cout)
    out_nhwc = y * scale + shift
    return jnp.transpose(out_nhwc, (0, 3, 1, 2)).astype(x_nchw.dtype)


# ----------------------------------------------------------------------------
# Pure-JAX reference matching PyTorch semantics (training-mode BN, f32)
# ----------------------------------------------------------------------------
def reference(x, w, b, gamma, beta, *, padding, dilation, negative_slope,
              eps=1e-5):
    out = lax.conv_general_dilated(
        x, w, window_strides=(1, 1),
        padding=[(padding, padding), (padding, padding)],
        rhs_dilation=(dilation, dilation),
        dimension_numbers=('NCHW', 'OIHW', 'NCHW'))
    out = out + b.reshape(1, -1, 1, 1)
    out = jnp.where(out >= 0, out, negative_slope * out)
    mean = jnp.mean(out, axis=(0, 2, 3), keepdims=True)
    var = jnp.mean((out - mean) ** 2, axis=(0, 2, 3), keepdims=True)
    out = (out - mean) * lax.rsqrt(var + eps)
    return gamma.reshape(1, -1, 1, 1) * out + beta.reshape(1, -1, 1, 1)


if __name__ == "__main__":
    input_channels = 4
    layer_width = 8
    kernel_size = 3
    padding = 1
    dilation = 1
    negative_slope = 0.2

    key = jax.random.PRNGKey(0)
    kx, kw, kb = jax.random.split(key, 3)

    x = jax.random.normal(kx, (2, input_channels, 16, 16), jnp.float32)
    weight = 0.1 * jax.random.normal(
        kw, (layer_width, input_channels, kernel_size, kernel_size),
        jnp.float32)
    bias = 0.1 * jax.random.normal(kb, (layer_width,), jnp.float32)
    gamma = jnp.ones((layer_width,), jnp.float32)   # BatchNorm2d default weight
    beta = jnp.zeros((layer_width,), jnp.float32)   # BatchNorm2d default bias

    out = conv2d_leakyrelu_bn(
        x, weight, bias, gamma, beta,
        padding=padding, dilation=dilation, negative_slope=negative_slope)
    out = jax.block_until_ready(out)

    ref = reference(
        x, weight, bias, gamma, beta,
        padding=padding, dilation=dilation, negative_slope=negative_slope)

    assert out.shape == ref.shape
    # Tolerance sized for bf16 MXU inputs + bf16 activation storage (f32 ref).
    assert jnp.allclose(out, ref, atol=3e-2, rtol=3e-2)
    print("KERNEL_OK")
</pallas_src>

<mosaic_0001>
module attributes {stable_mosaic.version = 11 : i64} {
  func.func @conv_lrelu_stats_kernel(%arg0: i32, %arg1: memref<1x18x72xbf16, #tpu.memory_space<vmem>>, %arg2: memref<3x72x128xbf16, #tpu.memory_space<vmem>>, %arg3: memref<1x128xf32, #tpu.memory_space<vmem>>, %arg4: memref<16x128xbf16, #tpu.memory_space<vmem>>, %arg5: memref<1x2x128xf32, #tpu.memory_space<vmem>>) attributes {dimension_semantics = [#tpu.dimension_semantics<parallel>], iteration_bounds = array<i64: 2>, scalar_prefetch = 0 : i64, scratch_operands = 0 : i64, tpu.core_type = #tpu.core_type<tc>, window_params = [{transform_indices = @transform_0, window_bounds = array<i64: 1, 18, 72>}, {pipeline_mode = #tpu.pipeline_mode<synchronous>, transform_indices = @transform_1, window_bounds = array<i64: 3, 72, 128>}, {pipeline_mode = #tpu.pipeline_mode<synchronous>, transform_indices = @transform_2, window_bounds = array<i64: 1, 128>}, {transform_indices = @transform_3, window_bounds = array<i64: 16, 128>}, {transform_indices = @transform_4, window_bounds = array<i64: 1, 2, 128>}]} {
    %c0 = arith.constant 0 : index
    %c0_0 = arith.constant 0 : index
    %0 = vector.load %arg3[%c0, %c0_0] : memref<1x128xf32, #tpu.memory_space<vmem>>, vector<1x128xf32>
    %1 = vector.shape_cast %0 : vector<1x128xf32> to vector<1x128xf32>
    %2 = vector.broadcast %1 : vector<1x128xf32> to vector<16x128xf32>
    %c0_1 = arith.constant 0 : index
    %c0_2 = arith.constant 0 : index
    %c0_3 = arith.constant 0 : index
    %3 = vector.load %arg1[%c0_1, %c0_2, %c0_3] : memref<1x18x72xbf16, #tpu.memory_space<vmem>>, vector<1x16x72xbf16>
    %4 = vector.shape_cast %3 : vector<1x16x72xbf16> to vector<16x72xbf16>
    %c0_4 = arith.constant 0 : index
    %c0_5 = arith.constant 0 : index
    %c0_6 = arith.constant 0 : index
    %5 = vector.load %arg2[%c0_4, %c0_5, %c0_6] : memref<3x72x128xbf16, #tpu.memory_space<vmem>>, vector<1x72x128xbf16>
    %6 = vector.shape_cast %5 : vector<1x72x128xbf16> to vector<72x128xbf16>
    %cst = arith.constant dense<0.000000e+00> : vector<16x128xf32>
    %7 = tpu.matmul %4, %6, %cst {dimension_numbers = #tpu.dot_dimension_numbers<[1], [0], [0], [1], [0, 0, 1, 1], [], []>} : vector<16x72xbf16>, vector<72x128xbf16>, vector<16x128xf32> -> vector<16x128xf32>
    %8 = arith.addf %2, %7 : vector<16x128xf32>
    %c0_7 = arith.constant 0 : index
    %c1 = arith.constant 1 : index
    %c0_8 = arith.constant 0 : index
    %9 = vector.load %arg1[%c0_7, %c1, %c0_8] : memref<1x18x72xbf16, #tpu.memory_space<vmem>>, vector<1x16x72xbf16>
    %10 = vector.shape_cast %9 : vector<1x16x72xbf16> to vector<16x72xbf16>
    %c1_9 = arith.constant 1 : index
    %c0_10 = arith.constant 0 : index
    %c0_11 = arith.constant 0 : index
    %11 = vector.load %arg2[%c1_9, %c0_10, %c0_11] : memref<3x72x128xbf16, #tpu.memory_space<vmem>>, vector<1x72x128xbf16>
    %12 = vector.shape_cast %11 : vector<1x72x128xbf16> to vector<72x128xbf16>
    %cst_12 = arith.constant dense<0.000000e+00> : vector<16x128xf32>
    %13 = tpu.matmul %10, %12, %cst_12 {dimension_numbers = #tpu.dot_dimension_numbers<[1], [0], [0], [1], [0, 0, 1, 1], [], []>} : vector<16x72xbf16>, vector<72x128xbf16>, vector<16x128xf32> -> vector<16x128xf32>
    %14 = arith.addf %8, %13 : vector<16x128xf32>
    %c0_13 = arith.constant 0 : index
    %c2 = arith.constant 2 : index
    %c0_14 = arith.constant 0 : index
    %15 = vector.load %arg1[%c0_13, %c2, %c0_14] : memref<1x18x72xbf16, #tpu.memory_space<vmem>>, vector<1x16x72xbf16>
    %16 = vector.shape_cast %15 : vector<1x16x72xbf16> to vector<16x72xbf16>
    %c2_15 = arith.constant 2 : index
    %c0_16 = arith.constant 0 : index
    %c0_17 = arith.constant 0 : index
    %17 = vector.load %arg2[%c2_15, %c0_16, %c0_17] : memref<3x72x128xbf16, #tpu.memory_space<vmem>>, vector<1x72x128xbf16>
    %18 = vector.shape_cast %17 : vector<1x72x128xbf16> to vector<72x128xbf16>
    %cst_18 = arith.constant dense<0.000000e+00> : vector<16x128xf32>
    %19 = tpu.matmul %16, %18, %cst_18 {dimension_numbers = #tpu.dot_dimension_numbers<[1], [0], [0], [1], [0, 0, 1, 1], [], []>} : vector<16x72xbf16>, vector<72x128xbf16>, vector<16x128xf32> -> vector<16x128xf32>
    %20 = arith.addf %14, %19 : vector<16x128xf32>
    %cst_19 = arith.constant 0.000000e+00 : f32
    %21 = vector.broadcast %cst_19 : f32 to vector<16x128xf32>
    %22 = arith.cmpf oge, %20, %21 : vector<16x128xf32>
    %cst_20 = arith.constant 2.000000e-01 : f32
    %23 = vector.broadcast %cst_20 : f32 to vector<16x128xf32>
    %24 = arith.mulf %23, %20 : vector<16x128xf32>
    %25 = arith.select %22, %20, %24 : vector<16x128xi1>, vector<16x128xf32>
    %26 = arith.truncf %25 : vector<16x128xf32> to vector<16x128xbf16>
    %c0_21 = arith.constant 0 : index
    %c0_22 = arith.constant 0 : index
    %27 = vector.load %arg4[%c0_21, %c0_22] : memref<16x128xbf16, #tpu.memory_space<vmem>>, vector<16x128xbf16>
    tpu.vector_store %arg4[%c0_21, %c0_22], %26 {strides = array<i32>} : memref<16x128xbf16, #tpu.memory_space<vmem>>, vector<16x128xbf16>,
    %cst_23 = arith.constant dense<0.000000e+00> : vector<128xf32>
    %28 = vector.multi_reduction <add>, %25, %cst_23 [0] : vector<16x128xf32> to vector<128xf32>
    %29 = vector.shape_cast %28 : vector<128xf32> to vector<1x128xf32>
    %30 = arith.mulf %25, %25 : vector<16x128xf32>
    %cst_24 = arith.constant dense<0.000000e+00> : vector<128xf32>
    %31 = vector.multi_reduction <add>, %30, %cst_24 [0] : vector<16x128xf32> to vector<128xf32>
    %32 = vector.shape_cast %31 : vector<128xf32> to vector<1x128xf32>
    %33 = tpu.concatenate %29, %32 in 0 : vector<1x128xf32>, vector<1x128xf32> -> vector<2x128xf32>
    %c0_25 = arith.constant 0 : index
    %c0_26 = arith.constant 0 : index
    %c0_27 = arith.constant 0 : index
    %34 = vector.load %arg5[%c0_25, %c0_26, %c0_27] : memref<1x2x128xf32, #tpu.memory_space<vmem>>, vector<1x2x128xf32>
    %35 = vector.shape_cast %34 : vector<1x2x128xf32> to vector<2x128xf32>
    %36 = vector.shape_cast %33 : vector<2x128xf32> to vector<1x2x128xf32>
    tpu.vector_store %arg5[%c0_25, %c0_26, %c0_27], %36 {strides = array<i32>} : memref<1x2x128xf32, #tpu.memory_space<vmem>>, vector<1x2x128xf32>,
    return
  }
  func.func @transform_0(%arg0: i32) -> (i32, i32, i32) {
    %c0_i32 = arith.constant 0 : i32
    %c0_i32_0 = arith.constant 0 : i32
    %c0_i32_1 = arith.constant 0 : i32
    return %arg0, %c0_i32, %c0_i32_0 : i32, i32, i32
  }
  func.func @transform_1(%arg0: i32) -> (i32, i32, i32) {
    %c0_i32 = arith.constant 0 : i32
    %c0_i32_0 = arith.constant 0 : i32
    %c0_i32_1 = arith.constant 0 : i32
    %c0_i32_2 = arith.constant 0 : i32
    return %c0_i32, %c0_i32_0, %c0_i32_1 : i32, i32, i32
  }
  func.func @transform_2(%arg0: i32) -> (i32, i32) {
    %c0_i32 = arith.constant 0 : i32
    %c0_i32_0 = arith.constant 0 : i32
    %c0_i32_1 = arith.constant 0 : i32
    return %c0_i32, %c0_i32_0 : i32, i32
  }
  func.func @transform_3(%arg0: i32) -> (i32, i32) {
    %c0_i32 = arith.constant 0 : i32
    %c0_i32_0 = arith.constant 0 : i32
    return %arg0, %c0_i32 : i32, i32
  }
  func.func @transform_4(%arg0: i32) -> (i32, i32, i32) {
    %c0_i32 = arith.constant 0 : i32
    %c0_i32_0 = arith.constant 0 : i32
    %c0_i32_1 = arith.constant 0 : i32
    return %arg0, %c0_i32, %c0_i32_0 : i32, i32, i32
  }
}

</mosaic_0001>

<bundles_post_ra>
// kernel: tpu_custom_call.1
= control target key start
LH: loop header
LB: loop body
LE: loop exit
PB: predicated region body
PF: predicated region fallthrough
CT: control target
= control target key end

     0   :  { %10 = vsyncpa [#allocation3], 0  ;;  %s1271_s0 = inlined_call_operand.vmem [shape: bf16[2,18,72], index: 0, kind: input, shape index: {}]   ;;  %s1272_s1 = inlined_call_operand.hbm [shape: bf16[3,72,128], index: 1, kind: input, shape index: {}]   ;;  %s1273_s2 = inlined_call_operand.vmem [shape: f32[1,128], index: 2, kind: input, shape index: {}]   ;;  %s1274_s3 = inlined_call_operand.hbm [shape: bf16[32,128], index: 3, kind: output, shape index: {0}]   ;;  %s1275_s4 = inlined_call_operand.hbm [shape: f32[2,2,128], index: 4, kind: output, shape index: {1}]  }
   0x1   :  { %11 = vsyncpa [#allocation4], 0 }
   0x2   :  { %13 = vsyncpa [#allocation4 + $0x1], 0 }
   0x3   :  { %14 = vsyncpa [#allocation7], 0 }
   0x4   :  { %16 = vsyncpa [#allocation7 + $0x1], 0  ;;  %s1062_s15 = smov 0   ;;  %s1064_s16 = smov 0  }
   0x5   :  { %s1066_s17 = smov 0   ;;  %s1068_s18 = smov 0  }
   0x6 LB: > { %s1083_s19 = sadd.s32 4294967295, %s1026_s18   ;;  %s702_s20 = sadd.s32 4294967294, %s1026_s18   ;;  %s1026_s18 = sphi %s1068_s18, %s1291_s18   ;;  %s1022_s17 = sphi %s1066_s17, %s1290_s17   ;;  %s1018_s16 = sphi %s1064_s16, %s1289_s16   ;;  %s1014_s15 = sphi %s1062_s15, %s1288_s15  }
   0x7   : > { %s1087_s21 = sadd.s32 1, %s1026_s18   ;;  %s97_s22 = sadd.s32 1, %s1022_s17 }
   0x8   : > { %s94_s23 = ssub.s32 %s1026_s18, %s1087_s21  ;;  %p107_p0 = scmp.ne.s32.totalorder %s1022_s17, %s1018_s16 }
   0x9   : > { %p95_p1 = scmp.eq.s32.totalorder %s94_s23, 0  ;;  %p108_p2 = scmp.eq.s32.totalorder %s1083_s19, 1 }
   0xa   : > { %p113_p3 = scmp.ne.s32.totalorder %s1018_s16, %s1014_s15  ;;  %p114_p4 = scmp.eq.s32.totalorder %s702_s20, 1 }
   0xb   : > { %s1098_s24 = scalar_select %p95_p1, %s1022_s17, %s97_s22  }
   0xc   : > { %p1100_p5 = por %p108_p2, %p107_p0  ;;  %p1104_p6 = por %p114_p4, %p113_p3 }
   0xd   : > { %p703_p7 = scmp.ge.s32.totalorder %s1026_s18, 1  ;;  %p147_p8 = scmp.lt.s32.totalorder %s1026_s18, 3 }
   0xe   : > { %s1279_s25 = scalar_select %p1100_p5, 1, 0 }
   0xf   : > { %s1280_s26 = scalar_select %p1104_p6, 1, 0 }
  0x10   : > { %p1276_p9 = scmp.eq.s32.totalorder %s1083_s19, 0  ;;  %p1111_p10 = pnand %p703_p7, %p147_p8 }
  0x11   : > { %s1028_s28 = smov [#allocation2]   ;;  %s900_s7 = scalar_lea.hbm %s1272_s1, 1728 }
  0x12   : > { %s1281_s27 = scalar_select %p1111_p10, 1, 0 }
  0x13   : > { %s159_s29 = sshll.u32 %s1028_s28, 4  ;;  %p828_p11 = pneg %p1111_p10  ;;  %s160_s29 = int_to_ptr.vmem [resolvable:$true] %s159_s29 }
  0x14   : > { %p901_p13 = scmp.ne.s32.totalorder %s1272_s1, %s900_s7  ;;  %p907_p3 = scmp.lt.u32.totalorder %s900_s7, %s1272_s1 }
  0x15   : > { %p1119_p12 = pnand %p1276_p9, %p828_p11 }
  0x17   : > { %p902_p0 = pneg %p1119_p12 }
  0x19   : > { %p903_p1 = pnand %p902_p0, %p901_p13 }
  0x1b   : > { %p904_p2 = pneg %p903_p1 }
  0x1d   : > { %p909_p4 = pnand %p907_p3, %p904_p2 }
  0x1f   : > { %912 = shalt.err (!%p909_p4)
}
  0x20   : > { %s913_s12 = scalar_lea.vmem %s160_s29, 1728  ;;  %p921_p9 = scmp.lt.s32.totalorder %s160_s29, %s160_s29 }
  0x21   : > { %p914_p7 = scmp.ne.s32.totalorder %s160_s29, %s913_s12  ;;  %p922_p6 = scmp.lt.s32.totalorder %s913_s12, %s913_s12 }
  0x23   : > { %p916_p8 = pnand %p914_p7, %p902_p0  ;;  %p923_p5 = por %p922_p6, %p921_p9 }
  0x25   : > { %p917_p11 = pneg %p916_p8 }
  0x27   : > { %p924_p10 = pnand %p923_p5, %p917_p11 }
  0x29   : > { %927 = shalt.err (!%p924_p10)
}
  0x2a   : > { %s1029_s13 = smov 64   ;;  %s1030_s14 = smov 4  }
  0x2b   : > { %831 = dma.hbm_to_vmem [thread:$0]  (!%p1119_p12), %s1272_s1, 1728, %s160_s29, [#allocation3], %s1029_s13, %s1029_s13, %s1030_s14  }
  0x2c   : > { %p1283_p13 = scmp.ne.s32.totalorder %s1281_s27, 0 }
  0x2d   : > { %p1284_p1 = scmp.eq.s32.totalorder (!%p1283_p13), %s1083_s19, 0 }
  0x2e   : > { %186 = sbr.rel (%p1283_p13) target bundleno = 357 (0x165), region = 32 }
  0x35   : > { %1001 = dma.done.wait (%p1284_p1), [#allocation3], 1728   ;;  %p1285_p0 = pmov %p1284_p1 }
  0x36   : > { %p217_p5 = scmp.lt.s32.totalorder %s1083_s19, 1  ;;  %v1031_v0 = vmov 0.0   ;;  %vm1032_vm0 = vmmov 0   ;;  %v881_v1 = vld [vmem:[#allocation2 + $0x24] sm:$0xff]   ;;  %v882_v2 = vld [vmem:[#allocation2 + $0x2c] sm:$0xff]   ;;  %v883_v4 = vld [vmem:[#allocation2 + $0x34] sm:$0xff]  }
  0x37   : > { %1003 = vsyncadd (%p1285_p0), [#allocation3], 4294965568  ;;  %783 = vmatprep.subr.bf16.mxu0 %v1031_v0  ;;  %769 = vmatprep.subr.bf16.mxu1 %v1031_v0  ;;  %v885_v3 = vld [vmem:[#allocation2] sm:$0xff]   ;;  %vm278_vm1 = vcmask 1043456   ;;  %v887_v5 = vld [vmem:[#allocation2 + $0x8] sm:$0xff]   ;;  %vm274_vm3 = vcmask 588800  }
  0x38   : > { %793 = vmatprep.mubr.msk.bf16.mxu0 %vm1032_vm0, %v1031_v0  ;;  %s218_s23 = scalar_select %p217_p5, %s1083_s19, 1  ;;  %779 = vmatprep.mubr.msk.bf16.mxu1 %vm1032_vm0, %v1031_v0  ;;  %v886_v7 = vld [vmem:[#allocation2 + $0x44] ss:$0 sps:$4 sm:$0xff]   ;;  %v884_v9 = vld [vmem:[#allocation2 + $0x3c] sm:$0xff]   ;;  %v891_v15 = vld [vmem:[#allocation2 + $0x10] sm:$0xff]   ;;  %vm449_vm4 = vcmask 1046528  }
  0x39   : > { %784 = vmatpush3.bf16.msra.mxu0 %v881_v1  ;;  %770 = vmatpush3.bf16.msra.mxu1 %v885_v3  ;;  %vm346_vm2 = vsmask.f32 7424  ;;  %v390_v17 = vsel %vm278_vm1, %v886_v7, 0  ;;  %v893_v20 = vld [vmem:[#allocation2 + $0x18] sm:$0xff]   ;;  %v895_v21 = vld [vmem:[#allocation2 + $0x20] ss:$0 sps:$4 sm:$0xff]  }
  0x3a   : > { %s819_s27 = smul.u32 12, %s218_s23  ;;  %785 = vmatprep.subr.bf16.mxu0 %v1031_v0  ;;  %771 = vmatprep.subr.bf16.mxu1 %v1031_v0  ;;  %v890_v23 = vld [vmem:[#allocation2 + $0x48] sm:$0xff]   ;;  %v280_v24 = vsel %vm278_vm1, %v895_v21, 0  ;;  %v892_v26 = vld [vmem:[#allocation2 + $0x50] sm:$0xff]   ;;  %v894_v27 = vld [vmem:[#allocation2 + $0x58] sm:$0xff]   ;;  %s1188_s7 = sand.u32 1, %s1018_s16  }
  0x3b   : > { %v896_v29 = vld [vmem:[#allocation2 + $0x60] sm:$0xff]   ;;  %v898_v31 = vld [vmem:[#allocation2 + $0x68] ss:$0 sps:$4 sm:$0xff]   ;;  %s708_s8 = sshll.u32 %s1188_s7, 3  ;;  %s745_s9 = sshll.u32 %s1083_s19, 7 }
  0x3c   : > { %s1157_s30 = scalar_lea.vmem %s1271_s0, %s819_s27  ;;  %v484_v34 = vsel %vm278_vm1, %v898_v31, 0  ;;  %v711_v40 = vld [vmem:[%s1273_s2] ss:$0 sm:$0xff]  ;;  %s209_s10 = scalar_lea.vmem [#allocation5], %s708_s8 }
  0x3d   : > { %786 = vmatpush3.bf16.msra.mxu0 %v882_v2  ;;  %v325_v6 = vld [vmem:[%s1157_s30] sm:$0xf]  ;;  %v326_v8 = vld [vmem:[%s1157_s30 + $0x4] sm:$0xf]  ;;  %772 = vmatpush3.bf16.msra.mxu1 %v887_v5  ;;  %s583_s11 = sshll.u32 %s209_s10, 4  ;;  %s1195_s14 = scalar_lea.hbm %s1274_s3, %s745_s9  ;;  %s1197_s11 = int_to_ptr.vmem [resolvable:$true] %s583_s11 }
  0x3e   : > { %787 = vmatprep.subr.bf16.mxu0 %v1031_v0  ;;  %v719_v10 = vcombine.low %v325_v6, %v326_v8  ;;  %v889_v11 = vld [vmem:[%s1157_s30 + $0x8] ss:$0 sps:$4 sm:$0x11]   ;;  %773 = vmatprep.subr.bf16.mxu1 %v1031_v0  ;;  %v897_v25 = vld [vmem:[%s1157_s30] sm:$0xff]   ;;  %s565_s20 = scalar_lea.sflag [#allocation4], %s1188_s7  ;;  %s928_s22 = scalar_lea.vmem %s1197_s11, 128 }
  0x3f   : > { %v355_v14 = vshll.u32 %v889_v11, 16  ;;  %v435_v28 = vld [vmem:[%s1157_s30] sm:$0xe]  ;;  %v451_v33 = vrot.slane %v889_v11, 1  ;;  %p929_p6 = scmp.ne.s32.totalorder %s1197_s11, %s928_s22  ;;  %p1286_p9 = scmp.ne.s32.totalorder %s1279_s25, 0 }
  0x40   : > { %v348_v12 = vshrl.u32 %v719_v10, 16  ;;  %v350_v13 = vshll.u32 %v719_v10, 16  ;;  %v727_v30 = vcombine.low %v435_v28, %v326_v8  ;;  %s1033_s23 = smov [#allocation5]  }
  0x41   : > { %788 = vmatpush3.bf16.msra.mxu0 %v883_v4  ;;  %v357_v19 = vrot.slane %v355_v14, 1  ;;  %774 = vmatpush3.bf16.msra.mxu1 %v891_v15  ;;  %p930_p10 = pnand %p929_p6, %p1286_p9  ;;  %s932_s27 = sshll.u32 %s1033_s23, 4  ;;  %s933_s27 = int_to_ptr.vmem [resolvable:$false] %s932_s27 }
  0x42   : > { %789 = vmatprep.subr.bf16.mxu0 %v1031_v0  ;;  %v352_v16 = vrot.slane %v350_v13, 1  ;;  %775 = vmatprep.subr.bf16.mxu1 %v1031_v0  ;;  %v450_v32 = vrot.slane %v727_v30, 1  ;;  %s934_s28 = scalar_lea.vmem %s933_s27, 256  ;;  %p935_p2 = scmp.lt.s32.totalorder %s1197_s11, %s933_s27 }
  0x43   : > { %p931_p12 = pneg %p930_p10  ;;  %p936_p3 = scmp.lt.s32.totalorder %s934_s28, %s928_s22 }
  0x44   : > { %v353_v18 = vor.u32 %v352_v16, %v348_v12  ;;  %v452_v35 = vsel %vm449_vm4, %v450_v32, %v451_v33 }
  0x45   : > { %790 = vmatpush3.bf16.msra.mxu0 %v884_v9  ;;  %776 = vmatpush3.bf16.msra.mxu1 %v893_v20  ;;  %p937_p4 = por %p936_p3, %p935_p2 }
  0x46   : > { %791 = vmatprep.subr.bf16.mxu0 %v1031_v0  ;;  %v358_v22 = vsel %vm346_vm2, %v353_v18, %v357_v19  ;;  %777 = vmatprep.subr.bf16.mxu1 %v1031_v0 }
  0x47   : > { %p938_p7 = pnand %p937_p4, %p931_p12 }
  0x49   : > { %792 = vmatpush3.bf16.msra.mxu0 %v390_v17  ;;  %778 = vmatpush3.bf16.msra.mxu1 %v280_v24 }
  0x4a   : > { %797 = vmatprep.subr.bf16.mxu0 %v1031_v0 }
  0x4c   : > { %794 = vmatmul.mubr.msk.bf16.vlgmr.msra.gmra.mrb[0].mxu0 %vm274_vm3, %v358_v22  ;;  %780 = vmatmul.mubr.msk.bf16.vlgmr.msra.gmra.mrb[0].mxu1 %vm274_vm3, %v897_v25 }
  0x4d   : > { %798 = vmatpush3.bf16.msra.mxu0 %v890_v23  ;;  %807 = vmatprep.mubr.msk.bf16.mxu0 %vm1032_vm0, %v1031_v0 }
  0x4e   : > { %799 = vmatprep.subr.bf16.mxu0 %v1031_v0 }
  0x51   : > { %800 = vmatpush3.bf16.msra.mxu0 %v892_v26 }
  0x52   : > { %801 = vmatprep.subr.bf16.mxu0 %v1031_v0 }
  0x55   : > { %802 = vmatpush3.bf16.msra.mxu0 %v894_v27 }
  0x56   : > { %803 = vmatprep.subr.bf16.mxu0 %v1031_v0 }
  0x59   : > { %804 = vmatpush3.bf16.msra.mxu0 %v896_v29 }
  0x5a   : > { %805 = vmatprep.subr.bf16.mxu0 %v1031_v0 }
  0x5d   : > { %806 = vmatpush3.bf16.msra.mxu0 %v484_v34 }
  0x60   : > { %808 = vmatmul.mubr.msk.bf16.vlgmr.msra.gmra.mrb[0].mxu0 %vm274_vm3, %v452_v35 }
 0x11f   : > { %v316_v36 = vpop.f32.mrb[0].mxu1 }
 0x120   : > { %v781_v37 = vpop.f32.mrb[1].mxu1  ;;  %v323_v41 = vadd.f32 %v711_v40, %v316_v36 }
 0x121   : > { %v319_v38 = vpop.f32.mrb[2].mxu1 }
 0x122   : > { %v782_v39 = vpop.f32.mrb[3].mxu1  ;;  %v324_v43 = vadd.f32 %v711_v40, %v319_v38 }
 0x133   : > { %v520_v42 = vpop.f32.mrb[0].mxu0 }
 0x134   : > { %v812_v44 = vadd.f32 %v520_v42, %v323_v41  ;;  %v809_v45 = vpop.f32.mrb[1].mxu0 }
 0x135   : > { %v523_v46 = vpop.f32.mrb[2].mxu0 }
 0x136   : > { %vm529_vm5 = vcmp.ge.f32.partialorder %v812_v44, 0.0  ;;  %v531_v47 = vmul.f32 0.2, %v812_v44  ;;  %v814_v48 = vadd.f32 %v523_v46, %v324_v43  ;;  %v810_v49 = vpop.f32.mrb[3].mxu0 }
 0x138   : > { %v533_v50 = vsel %vm529_vm5, %v812_v44, %v531_v47  ;;  %vm530_vm6 = vcmp.ge.f32.partialorder %v814_v48, 0.0  ;;  %v532_v51 = vmul.f32 0.2, %v814_v48 }
 0x139   : > { %v552_v53 = vmul.f32 %v533_v50, %v533_v50 }
 0x13a   : > { %v534_v52 = vsel %vm530_vm6, %v814_v48, %v532_v51 }
 0x13b   : > { %v749_v54 = vpack.c.bf16 %v534_v52, %v533_v50  ;;  %v545_v55 = vadd.f32 %v534_v52, %v533_v50  ;;  %v553_v56 = vmul.f32 %v534_v52, %v534_v52 }
 0x13d   : > { %v546_v57 = vrot.slane %v545_v55, 4  ;;  %v554_v58 = vadd.f32 %v553_v56, %v552_v53  ;;  %750 = vst [vmem:[%s209_s10] sm:$0xff] %v749_v54  }
 0x13e   : > { %941 = shalt.err (!%p938_p7)
}
 0x13f   : > { %s942_s29 = scalar_lea.hbm %s1195_s14, 128  ;;  %s946_s6 = scalar_lea.hbm %s1274_s3, 256 }
 0x140   : > { %p943_p8 = scmp.ne.s32.totalorder %s1195_s14, %s942_s29  ;;  %p947_p1 = scmp.lt.u32.totalorder %s1195_s14, %s1274_s3 }
 0x141   : > { %p948_p0 = scmp.lt.u32.totalorder %s946_s6, %s942_s29  ;;  %p950_p6 = scmp.lt.u32.totalorder %s942_s29, %s1195_s14 }
 0x142   : > { %p944_p11 = pnand %p943_p8, %p1286_p9 }
 0x143   : > { %p949_p5 = por %p948_p0, %p947_p1 }
 0x144   : > { %p945_p13 = pneg %p944_p11 }
 0x145   : > { %p951_p10 = por %p950_p6, %p949_p5 }
 0x147   : > { %p952_p12 = pnand %p951_p10, %p945_p13 }
 0x149   : > { %955 = shalt.err (!%p952_p12)
}
 0x14a   : > { %s1034_s10 = smov 64   ;;  %s1035_s12 = smov 4   ;;  %v547_v59 = vadd.f32 %v546_v57, %v545_v55  ;;  %v555_v60 = vrot.slane %v554_v58, 4  ;;  %vm561_vm7 = vcmask 1040384  }
 0x14b   : > { %824 = dma.vmem_to_hbm [thread:$0]  (%p1286_p9), %s1197_s11, 128, %s1195_s14, %s565_s20, %s1034_s10, %s1034_s10, %s1035_s12  }
 0x14c   : > { %v548_v61 = vrot.slane %v547_v59, 2  ;;  %v556_v62 = vadd.f32 %v555_v60, %v554_v58  ;;  %s709_s13 = sshll.u32 %s1188_s7, 1  ;;  %s740_s22 = sshll.u32 %s1083_s19, 5 }
 0x14d   : > { %s216_s23 = scalar_lea.vmem [#allocation6], %s709_s13  ;;  %s1228_s14 = scalar_lea.hbm %s1275_s4, %s740_s22 }
 0x14e   : > { %v549_v63 = vadd.f32 %v548_v61, %v547_v59  ;;  %v557_v0 = vrot.slane %v556_v62, 2  ;;  %s599_s27 = sshll.u32 %s216_s23, 4  ;;  %s570_s20 = scalar_lea.sflag [#allocation7], %s1188_s7  ;;  %s1230_s27 = int_to_ptr.vmem [resolvable:$true] %s599_s27 }
 0x14f   : > { %s956_s29 = scalar_lea.vmem %s1230_s27, 32  ;;  %s1036_s19 = smov [#allocation6]  }
 0x150   : > { %v550_v1 = vrot.slane %v549_v63, 1  ;;  %v558_v2 = vadd.f32 %v557_v0, %v556_v62  ;;  %p957_p2 = scmp.ne.s32.totalorder %s1230_s27, %s956_s29  ;;  %s960_s30 = sshll.u32 %s1036_s19, 4  ;;  %s961_s30 = int_to_ptr.vmem [resolvable:$false] %s960_s30 }
 0x151   : > { %s962_s5 = scalar_lea.vmem %s961_s30, 64  ;;  %p963_p7 = scmp.lt.s32.totalorder %s1230_s27, %s961_s30 }
 0x152   : > { %v559_v3 = vrot.slane %v558_v2, 1  ;;  %v551_v4 = vadd.f32 %v550_v1, %v549_v63  ;;  %p958_p3 = pnand %p957_p2, %p1286_p9  ;;  %p964_p8 = scmp.lt.s32.totalorder %s962_s5, %s956_s29 }
 0x154   : > { %v560_v5 = vadd.f32 %v559_v3, %v558_v2  ;;  %p959_p4 = pneg %p958_p3  ;;  %p965_p11 = por %p964_p8, %p963_p7 }
 0x156   : > { %v562_v6 = vsel %vm561_vm7, %v551_v4, %v560_v5  ;;  %p966_p13 = pnand %p965_p11, %p959_p4 }
 0x157   : > { %563 = vst [vmem:[%s216_s23] sm:$0x3] %v562_v6 }
 0x158   : > { %969 = shalt.err (!%p966_p13)
}
 0x159   : > { %s970_s7 = scalar_lea.hbm %s1228_s14, 32  ;;  %s974_s9 = scalar_lea.hbm %s1275_s4, 64 }
 0x15a   : > { %p971_p1 = scmp.ne.s32.totalorder %s1228_s14, %s970_s7  ;;  %p975_p6 = scmp.lt.u32.totalorder %s1228_s14, %s1275_s4 }
 0x15b   : > { %p976_p10 = scmp.lt.u32.totalorder %s974_s9, %s970_s7  ;;  %p978_p2 = scmp.lt.u32.totalorder %s970_s7, %s1228_s14 }
 0x15c   : > { %p972_p0 = pnand %p971_p1, %p1286_p9 }
 0x15d   : > { %p977_p12 = por %p976_p10, %p975_p6 }
 0x15e   : > { %p973_p5 = pneg %p972_p0 }
 0x15f   : > { %p979_p3 = por %p978_p2, %p977_p12 }
 0x161   : > { %p980_p4 = pnand %p979_p3, %p973_p5 }
 0x163   : > { %983 = shalt.err (!%p980_p4)
}
 0x164   : > { %825 = dma.vmem_to_hbm [thread:$0]  (%p1286_p9), %s1230_s27, 32, %s1228_s14, %s570_s20  }
 0x165 PF: > { %p841_p7 = scmp.ge.s32.totalorder %s1026_s18, 2  ;;  %s611_s13 = sand.u32 1, %s1014_s15  }
 0x166   : > { %p1287_p8 = scmp.ne.s32.totalorder %s1280_s26, 0  ;;  %s612_s22 = scalar_lea.sflag [#allocation4], %s611_s13 }
 0x168   : > { %p833_p11 = pnand %p841_p7, %p1287_p8 }
 0x16a   : > { %1005 = dma.done.wait (!%p833_p11), %s612_s22, 128  }
 0x16b   : > { %1007 = vsyncadd (!%p833_p11), %s612_s22, 4294967168  ;;  %s621_s23 = scalar_lea.sflag [#allocation7], %s611_s13 }
 0x16c   : > { %1009 = dma.done.wait (!%p833_p11), %s621_s23, 32  }
 0x16d   : > { %1011 = vsyncadd (!%p833_p11), %s621_s23, 4294967264  ;;  %p19_p9 = scmp.ge.s32.totalorder %s1087_s21, 4   ;;  %s1288_s15 = smov %s1018_s16 }
 0x16e   : > { %s1289_s16 = smov %s1022_s17  ;;  %s1290_s17 = smov %s1098_s24 }
 0x16f   : > { %s1291_s18 = smov %s1087_s21  ;;  %21 = sbr.rel (!%p19_p9) target bundleno = 6 (0x6), region = 91 }
 0x176   :  { %626 = vsyncpa [#allocation3], 1 }
 0x177   :  { %628 = vsyncpa [#allocation3 + $0x1], 1 }
 0x178   :  { %629 = vsyncpa [#allocation4], 1 }
 0x179   :  { %631 = vsyncpa [#allocation4 + $0x1], 1 }
 0x17a   :  { %632 = vsyncpa [#allocation7], 1 }
 0x17b   :  { %634 = vsyncpa [#allocation7 + $0x1], 1 }

</bundles_post_ra>
